<compile_context>
chip_gen: v6e
topology: v6e:2x2x1
jax: 0.10.0
libtpu: 0.0.40
codegen_flags: <defaults>
</compile_context>

<pallas_src>
import functools

import jax
import jax.numpy as jnp
from jax import lax
from jax.experimental import pallas as pl
from jax.experimental.pallas import tpu as pltpu


def _residual_block_kernel(x_ref, m_ref, w1_ref, b1_ref, w2_ref, b2_ref,
                           o_ref, col_ref, *, H, W, Nb):
    # x_ref : (Nb, C, S)        Nb images, S = H*W on the lane dim
    # m_ref : (9, S)            per-tap SAME-padding validity masks (f32 0/1)
    # w*_ref: (C, 9*C)          packed conv weights, K index = (ky*3+kx)*C + ci
    # b*_ref: (C, 1)
    # o_ref : (Nb, C, S)
    # col_ref: (9*C, Nb*S) f32  im2col scratch, shared by both convs
    C = x_ref.shape[1]
    S = H * W

    x = x_ref[...].astype(jnp.float32)            # (Nb, C, S)
    masks = m_ref[...]                            # (9, S)

    def build_cols(images):
        # images: list of Nb (C, S) f32 arrays.
        # col[t*C + ci, b*S + s] = images[b][ci, s + off_t]  (0 outside image)
        for t in range(9):
            dy, dx = t // 3 - 1, t % 3 - 1
            off = dy * W + dx
            for b in range(Nb):
                if off == 0:
                    val = images[b]
                else:
                    # shifted[:, s] = img[:, s + off] (XLU lane rotate); any
                    # wrapped / cross-image lane lands on a masked-out target.
                    val = pltpu.roll(images[b], shift=(-off) % S, axis=1)
                    val = val * masks[t:t + 1, :]
                col_ref[pl.ds(t * C, C), pl.ds(b * S, S)] = val

    def conv(w_ref, b_ref):
        # (C, 9C) x (9C, Nb*S) on the MXU, f32 accumulate, bias folded in once.
        return jnp.dot(w_ref[...], col_ref[...],
                       preferred_element_type=jnp.float32,
                       precision=lax.Precision.HIGHEST) + b_ref[...]

    build_cols([x[b] for b in range(Nb)])
    y = jnp.maximum(conv(w1_ref, b1_ref), 0.0)    # conv1 + bias + ReLU

    build_cols([y[:, b * S:(b + 1) * S] for b in range(Nb)])
    y = conv(w2_ref, b2_ref)                      # conv2 + bias

    for b in range(Nb):                           # residual add, lane-dense store
        o_ref[b] = (x[b] + y[:, b * S:(b + 1) * S]).astype(o_ref.dtype)


def _pick_nb(N, target=8):
    # Amortize the ~0.35us per-step overhead by folding several images per
    # grid step, but keep >= 2 grid steps when N >= 2 so both v7x TensorCores
    # get work; Nb must divide N.
    cap = max(1, N // 2) if N >= 2 else 1
    nb = min(target, cap)
    while N % nb:
        nb -= 1
    return nb


@jax.jit
def residual_block(x_nchw, w1, b1, w2, b2):
    """x_nchw: (N, C, H, W); w1/w2 in PyTorch OIHW layout (C, C, 3, 3)."""
    N, C, H, W = x_nchw.shape
    S = H * W
    Nb = _pick_nb(N)

    # NCHW flattened -> (N, C, H*W): channels on sublanes, spatial on lanes.
    x = x_nchw.reshape(N, C, S)

    def pack(w):  # OIHW -> (C_out, 9*C_in), K index = (ky*3+kx)*C_in + ci
        return jnp.transpose(w, (0, 2, 3, 1)).reshape(C, 9 * C).astype(jnp.float32)

    w1_p, w2_p = pack(w1), pack(w2)
    b1_p = b1.reshape(C, 1).astype(jnp.float32)
    b2_p = b2.reshape(C, 1).astype(jnp.float32)

    # SAME-padding validity masks, one row per tap (hoisted out of the kernel).
    hh = jnp.arange(S, dtype=jnp.int32) // W
    ww = jnp.arange(S, dtype=jnp.int32) % W
    rows = []
    for t in range(9):
        dy, dx = t // 3 - 1, t % 3 - 1
        rows.append((hh + dy >= 0) & (hh + dy < H) & (ww + dx >= 0) & (ww + dx < W))
    masks = jnp.stack(rows).astype(jnp.float32)   # (9, S)

    # Per-step VMEM: 2x dbl-buffered (Nb,C,S) blocks + (9C, Nb*S) scratch +
    # resident masks/weights — far below the 32 MiB scoped default (and v7x's
    # 64 MiB physical), so no vmem_limit_bytes override is needed here.
    kernel = functools.partial(_residual_block_kernel, H=H, W=W, Nb=Nb)
    out = pl.pallas_call(
        kernel,
        out_shape=jax.ShapeDtypeStruct((N, C, S), x.dtype),
        grid_spec=pltpu.PrefetchScalarGridSpec(
            num_scalar_prefetch=0,
            grid=(N // Nb,),
            in_specs=[
                pl.BlockSpec((Nb, C, S), lambda n: (n, 0, 0)),   # activations
                pl.BlockSpec((9, S), lambda n: (0, 0)),          # masks (resident)
                pl.BlockSpec((C, 9 * C), lambda n: (0, 0)),      # w1 packed
                pl.BlockSpec((C, 1), lambda n: (0, 0)),          # b1
                pl.BlockSpec((C, 9 * C), lambda n: (0, 0)),      # w2 packed
                pl.BlockSpec((C, 1), lambda n: (0, 0)),          # b2
            ],
            out_specs=pl.BlockSpec((Nb, C, S), lambda n: (n, 0, 0)),
            scratch_shapes=[pltpu.VMEM((9 * C, Nb * S), jnp.float32)],
        ),
        compiler_params=pltpu.CompilerParams(
            dimension_semantics=("parallel",)),
    )(x, masks, w1_p, b1_p, w2_p, b2_p)

    return out.reshape(N, C, H, W)


def ref_residual_block(x, w1, b1, w2, b2):
    """Pure-JAX reference mirroring the PyTorch module (NCHW)."""
    dn = ('NCHW', 'OIHW', 'NCHW')
    p = lax.Precision.HIGHEST
    y = lax.conv_general_dilated(x, w1, (1, 1), 'SAME', dimension_numbers=dn,
                                 precision=p)
    y = y + b1[None, :, None, None]
    y = jnp.maximum(y, 0.0)
    y = lax.conv_general_dilated(y, w2, (1, 1), 'SAME', dimension_numbers=dn,
                                 precision=p)
    y = y + b2[None, :, None, None]
    return x + y


if __name__ == "__main__":
    N, C, H, W = 2, 4, 16, 16
    key = jax.random.PRNGKey(0)
    kx, kw1, kb1, kw2, kb2 = jax.random.split(key, 5)

    # Deterministic parameter init (PyTorch Conv2d-style uniform bounds).
    fan_in = C * 3 * 3
    bound = 1.0 / (fan_in ** 0.5)
    x = jax.random.normal(kx, (N, C, H, W), jnp.float32)
    w1 = jax.random.uniform(kw1, (C, C, 3, 3), jnp.float32, -bound, bound)
    b1 = jax.random.uniform(kb1, (C,), jnp.float32, -bound, bound)
    w2 = jax.random.uniform(kw2, (C, C, 3, 3), jnp.float32, -bound, bound)
    b2 = jax.random.uniform(kb2, (C,), jnp.float32, -bound, bound)

    out = residual_block(x, w1, b1, w2, b2)
    out = jax.block_until_ready(out)

    ref = ref_residual_block(x, w1, b1, w2, b2)
    assert out.shape == (N, C, H, W)
    assert jnp.allclose(out, ref, atol=1e-4, rtol=1e-4), "mismatch vs reference"

    print("KERNEL_OK")
</pallas_src>

<mosaic_0001>
module attributes {stable_mosaic.version = 11 : i64} {
  func.func @_residual_block_kernel(%arg0: i32, %arg1: memref<1x4x256xf32, #tpu.memory_space<vmem>>, %arg2: memref<9x256xf32, #tpu.memory_space<vmem>>, %arg3: memref<4x36xf32, #tpu.memory_space<vmem>>, %arg4: memref<4x1xf32, #tpu.memory_space<vmem>>, %arg5: memref<4x36xf32, #tpu.memory_space<vmem>>, %arg6: memref<4x1xf32, #tpu.memory_space<vmem>>, %arg7: memref<1x4x256xf32, #tpu.memory_space<vmem>>, %arg8: memref<36x256xf32, #tpu.memory_space<vmem>>) attributes {dimension_semantics = [#tpu.dimension_semantics<parallel>], iteration_bounds = array<i64: 2>, scalar_prefetch = 0 : i64, scratch_operands = 1 : i64, tpu.core_type = #tpu.core_type<tc>, window_params = [{transform_indices = @transform_0, window_bounds = array<i64: 1, 4, 256>}, {pipeline_mode = #tpu.pipeline_mode<synchronous>, transform_indices = @transform_1, window_bounds = array<i64: 9, 256>}, {pipeline_mode = #tpu.pipeline_mode<synchronous>, transform_indices = @transform_2, window_bounds = array<i64: 4, 36>}, {pipeline_mode = #tpu.pipeline_mode<synchronous>, transform_indices = @transform_3, window_bounds = array<i64: 4, 1>}, {pipeline_mode = #tpu.pipeline_mode<synchronous>, transform_indices = @transform_4, window_bounds = array<i64: 4, 36>}, {pipeline_mode = #tpu.pipeline_mode<synchronous>, transform_indices = @transform_5, window_bounds = array<i64: 4, 1>}, {transform_indices = @transform_6, window_bounds = array<i64: 1, 4, 256>}]} {
    %c0 = arith.constant 0 : index
    %c0_0 = arith.constant 0 : index
    %c0_1 = arith.constant 0 : index
    %0 = vector.load %arg1[%c0, %c0_0, %c0_1] : memref<1x4x256xf32, #tpu.memory_space<vmem>>, vector<1x4x256xf32>
    %c0_2 = arith.constant 0 : index
    %c0_3 = arith.constant 0 : index
    %1 = vector.load %arg2[%c0_2, %c0_3] : memref<9x256xf32, #tpu.memory_space<vmem>>, vector<9x256xf32>
    %2 = vector.shape_cast %0 : vector<1x4x256xf32> to vector<4x256xf32>
    %c17_i32 = arith.constant 17 : i32
    %3 = tpu.dynamic_rotate %2 by %c17_i32 dim 1 : vector<4x256xf32>, i32 -> vector<4x256xf32>
    %4 = vector.extract_strided_slice %1 {offsets = [0, 0], sizes = [1, 256], strides = [1, 1]} : vector<9x256xf32> to vector<1x256xf32>
    %5 = vector.broadcast %4 : vector<1x256xf32> to vector<4x256xf32>
    %6 = arith.mulf %3, %5 : vector<4x256xf32>
    %c0_4 = arith.constant 0 : index
    %c0_5 = arith.constant 0 : index
    %7 = vector.load %arg8[%c0_4, %c0_5] : memref<36x256xf32, #tpu.memory_space<vmem>>, vector<4x256xf32>
    tpu.vector_store %arg8[%c0_4, %c0_5], %6 {strides = array<i32>} : memref<36x256xf32, #tpu.memory_space<vmem>>, vector<4x256xf32>,
    %c16_i32 = arith.constant 16 : i32
    %8 = tpu.dynamic_rotate %2 by %c16_i32 dim 1 : vector<4x256xf32>, i32 -> vector<4x256xf32>
    %9 = vector.extract_strided_slice %1 {offsets = [1, 0], sizes = [1, 256], strides = [1, 1]} : vector<9x256xf32> to vector<1x256xf32>
    %10 = vector.broadcast %9 : vector<1x256xf32> to vector<4x256xf32>
    %11 = arith.mulf %8, %10 : vector<4x256xf32>
    %c4 = arith.constant 4 : index
    %c0_6 = arith.constant 0 : index
    %12 = vector.load %arg8[%c4, %c0_6] : memref<36x256xf32, #tpu.memory_space<vmem>>, vector<4x256xf32>
    tpu.vector_store %arg8[%c4, %c0_6], %11 {strides = array<i32>} : memref<36x256xf32, #tpu.memory_space<vmem>>, vector<4x256xf32>,
    %c15_i32 = arith.constant 15 : i32
    %13 = tpu.dynamic_rotate %2 by %c15_i32 dim 1 : vector<4x256xf32>, i32 -> vector<4x256xf32>
    %14 = vector.extract_strided_slice %1 {offsets = [2, 0], sizes = [1, 256], strides = [1, 1]} : vector<9x256xf32> to vector<1x256xf32>
    %15 = vector.broadcast %14 : vector<1x256xf32> to vector<4x256xf32>
    %16 = arith.mulf %13, %15 : vector<4x256xf32>
    %c8 = arith.constant 8 : index
    %c0_7 = arith.constant 0 : index
    %17 = vector.load %arg8[%c8, %c0_7] : memref<36x256xf32, #tpu.memory_space<vmem>>, vector<4x256xf32>
    tpu.vector_store %arg8[%c8, %c0_7], %16 {strides = array<i32>} : memref<36x256xf32, #tpu.memory_space<vmem>>, vector<4x256xf32>,
    %c1_i32 = arith.constant 1 : i32
    %18 = tpu.dynamic_rotate %2 by %c1_i32 dim 1 : vector<4x256xf32>, i32 -> vector<4x256xf32>
    %19 = vector.extract_strided_slice %1 {offsets = [3, 0], sizes = [1, 256], strides = [1, 1]} : vector<9x256xf32> to vector<1x256xf32>
    %20 = vector.broadcast %19 : vector<1x256xf32> to vector<4x256xf32>
    %21 = arith.mulf %18, %20 : vector<4x256xf32>
    %c12 = arith.constant 12 : index
    %c0_8 = arith.constant 0 : index
    %22 = vector.load %arg8[%c12, %c0_8] : memref<36x256xf32, #tpu.memory_space<vmem>>, vector<4x256xf32>
    tpu.vector_store %arg8[%c12, %c0_8], %21 {strides = array<i32>} : memref<36x256xf32, #tpu.memory_space<vmem>>, vector<4x256xf32>,
    %c16 = arith.constant 16 : index
    %c0_9 = arith.constant 0 : index
    %23 = vector.load %arg8[%c16, %c0_9] : memref<36x256xf32, #tpu.memory_space<vmem>>, vector<4x256xf32>
    tpu.vector_store %arg8[%c16, %c0_9], %2 {strides = array<i32>} : memref<36x256xf32, #tpu.memory_space<vmem>>, vector<4x256xf32>,
    %c255_i32 = arith.constant 255 : i32
    %24 = tpu.dynamic_rotate %2 by %c255_i32 dim 1 : vector<4x256xf32>, i32 -> vector<4x256xf32>
    %25 = vector.extract_strided_slice %1 {offsets = [5, 0], sizes = [1, 256], strides = [1, 1]} : vector<9x256xf32> to vector<1x256xf32>
    %26 = vector.broadcast %25 : vector<1x256xf32> to vector<4x256xf32>
    %27 = arith.mulf %24, %26 : vector<4x256xf32>
    %c20 = arith.constant 20 : index
    %c0_10 = arith.constant 0 : index
    %28 = vector.load %arg8[%c20, %c0_10] : memref<36x256xf32, #tpu.memory_space<vmem>>, vector<4x256xf32>
    tpu.vector_store %arg8[%c20, %c0_10], %27 {strides = array<i32>} : memref<36x256xf32, #tpu.memory_space<vmem>>, vector<4x256xf32>,
    %c241_i32 = arith.constant 241 : i32
    %29 = tpu.dynamic_rotate %2 by %c241_i32 dim 1 : vector<4x256xf32>, i32 -> vector<4x256xf32>
    %30 = vector.extract_strided_slice %1 {offsets = [6, 0], sizes = [1, 256], strides = [1, 1]} : vector<9x256xf32> to vector<1x256xf32>
    %31 = vector.broadcast %30 : vector<1x256xf32> to vector<4x256xf32>
    %32 = arith.mulf %29, %31 : vector<4x256xf32>
    %c24 = arith.constant 24 : index
    %c0_11 = arith.constant 0 : index
    %33 = vector.load %arg8[%c24, %c0_11] : memref<36x256xf32, #tpu.memory_space<vmem>>, vector<4x256xf32>
    tpu.vector_store %arg8[%c24, %c0_11], %32 {strides = array<i32>} : memref<36x256xf32, #tpu.memory_space<vmem>>, vector<4x256xf32>,
    %c240_i32 = arith.constant 240 : i32
    %34 = tpu.dynamic_rotate %2 by %c240_i32 dim 1 : vector<4x256xf32>, i32 -> vector<4x256xf32>
    %35 = vector.extract_strided_slice %1 {offsets = [7, 0], sizes = [1, 256], strides = [1, 1]} : vector<9x256xf32> to vector<1x256xf32>
    %36 = vector.broadcast %35 : vector<1x256xf32> to vector<4x256xf32>
    %37 = arith.mulf %34, %36 : vector<4x256xf32>
    %c28 = arith.constant 28 : index
    %c0_12 = arith.constant 0 : index
    %38 = vector.load %arg8[%c28, %c0_12] : memref<36x256xf32, #tpu.memory_space<vmem>>, vector<4x256xf32>
    tpu.vector_store %arg8[%c28, %c0_12], %37 {strides = array<i32>} : memref<36x256xf32, #tpu.memory_space<vmem>>, vector<4x256xf32>,
    %c239_i32 = arith.constant 239 : i32
    %39 = tpu.dynamic_rotate %2 by %c239_i32 dim 1 : vector<4x256xf32>, i32 -> vector<4x256xf32>
    %40 = vector.extract_strided_slice %1 {offsets = [8, 0], sizes = [1, 256], strides = [1, 1]} : vector<9x256xf32> to vector<1x256xf32>
    %41 = vector.broadcast %40 : vector<1x256xf32> to vector<4x256xf32>
    %42 = arith.mulf %39, %41 : vector<4x256xf32>
    %c32 = arith.constant 32 : index
    %c0_13 = arith.constant 0 : index
    %43 = vector.load %arg8[%c32, %c0_13] : memref<36x256xf32, #tpu.memory_space<vmem>>, vector<4x256xf32>
    tpu.vector_store %arg8[%c32, %c0_13], %42 {strides = array<i32>} : memref<36x256xf32, #tpu.memory_space<vmem>>, vector<4x256xf32>,
    %c0_14 = arith.constant 0 : index
    %c0_15 = arith.constant 0 : index
    %44 = vector.load %arg3[%c0_14, %c0_15] : memref<4x36xf32, #tpu.memory_space<vmem>>, vector<4x36xf32>
    %c0_16 = arith.constant 0 : index
    %c0_17 = arith.constant 0 : index
    %45 = vector.load %arg8[%c0_16, %c0_17] : memref<36x256xf32, #tpu.memory_space<vmem>>, vector<36x256xf32>
    %cst = arith.constant dense<0.000000e+00> : vector<4x256xf32>
    %46 = tpu.matmul %44, %45, %cst {dimension_numbers = #tpu.dot_dimension_numbers<[1], [0], [0], [1], [0, 0, 1, 1], [], []>, precision = #tpu.contract_precision<fp32>} : vector<4x36xf32>, vector<36x256xf32>, vector<4x256xf32> -> vector<4x256xf32>
    %c0_18 = arith.constant 0 : index
    %c0_19 = arith.constant 0 : index
    %47 = vector.load %arg4[%c0_18, %c0_19] : memref<4x1xf32, #tpu.memory_space<vmem>>, vector<4x1xf32>
    %48 = vector.broadcast %47 : vector<4x1xf32> to vector<4x256xf32>
    %49 = arith.addf %46, %48 : vector<4x256xf32>
    %cst_20 = arith.constant 0.000000e+00 : f32
    %50 = vector.broadcast %cst_20 : f32 to vector<4x256xf32>
    %51 = arith.maximumf %49, %50 : vector<4x256xf32>
    %c17_i32_21 = arith.constant 17 : i32
    %52 = tpu.dynamic_rotate %51 by %c17_i32_21 dim 1 : vector<4x256xf32>, i32 -> vector<4x256xf32>
    %53 = vector.extract_strided_slice %1 {offsets = [0, 0], sizes = [1, 256], strides = [1, 1]} : vector<9x256xf32> to vector<1x256xf32>
    %54 = vector.broadcast %53 : vector<1x256xf32> to vector<4x256xf32>
    %55 = arith.mulf %52, %54 : vector<4x256xf32>
    %c0_22 = arith.constant 0 : index
    %c0_23 = arith.constant 0 : index
    %56 = vector.load %arg8[%c0_22, %c0_23] : memref<36x256xf32, #tpu.memory_space<vmem>>, vector<4x256xf32>
    tpu.vector_store %arg8[%c0_22, %c0_23], %55 {strides = array<i32>} : memref<36x256xf32, #tpu.memory_space<vmem>>, vector<4x256xf32>,
    %c16_i32_24 = arith.constant 16 : i32
    %57 = tpu.dynamic_rotate %51 by %c16_i32_24 dim 1 : vector<4x256xf32>, i32 -> vector<4x256xf32>
    %58 = vector.extract_strided_slice %1 {offsets = [1, 0], sizes = [1, 256], strides = [1, 1]} : vector<9x256xf32> to vector<1x256xf32>
    %59 = vector.broadcast %58 : vector<1x256xf32> to vector<4x256xf32>
    %60 = arith.mulf %57, %59 : vector<4x256xf32>
    %c4_25 = arith.constant 4 : index
    %c0_26 = arith.constant 0 : index
    %61 = vector.load %arg8[%c4_25, %c0_26] : memref<36x256xf32, #tpu.memory_space<vmem>>, vector<4x256xf32>
    tpu.vector_store %arg8[%c4_25, %c0_26], %60 {strides = array<i32>} : memref<36x256xf32, #tpu.memory_space<vmem>>, vector<4x256xf32>,
    %c15_i32_27 = arith.constant 15 : i32
    %62 = tpu.dynamic_rotate %51 by %c15_i32_27 dim 1 : vector<4x256xf32>, i32 -> vector<4x256xf32>
    %63 = vector.extract_strided_slice %1 {offsets = [2, 0], sizes = [1, 256], strides = [1, 1]} : vector<9x256xf32> to vector<1x256xf32>
    %64 = vector.broadcast %63 : vector<1x256xf32> to vector<4x256xf32>
    %65 = arith.mulf %62, %64 : vector<4x256xf32>
    %c8_28 = arith.constant 8 : index
    %c0_29 = arith.constant 0 : index
    %66 = vector.load %arg8[%c8_28, %c0_29] : memref<36x256xf32, #tpu.memory_space<vmem>>, vector<4x256xf32>
    tpu.vector_store %arg8[%c8_28, %c0_29], %65 {strides = array<i32>} : memref<36x256xf32, #tpu.memory_space<vmem>>, vector<4x256xf32>,
    %c1_i32_30 = arith.constant 1 : i32
    %67 = tpu.dynamic_rotate %51 by %c1_i32_30 dim 1 : vector<4x256xf32>, i32 -> vector<4x256xf32>
    %68 = vector.extract_strided_slice %1 {offsets = [3, 0], sizes = [1, 256], strides = [1, 1]} : vector<9x256xf32> to vector<1x256xf32>
    %69 = vector.broadcast %68 : vector<1x256xf32> to vector<4x256xf32>
    %70 = arith.mulf %67, %69 : vector<4x256xf32>
    %c12_31 = arith.constant 12 : index
    %c0_32 = arith.constant 0 : index
    %71 = vector.load %arg8[%c12_31, %c0_32] : memref<36x256xf32, #tpu.memory_space<vmem>>, vector<4x256xf32>
    tpu.vector_store %arg8[%c12_31, %c0_32], %70 {strides = array<i32>} : memref<36x256xf32, #tpu.memory_space<vmem>>, vector<4x256xf32>,
    %c16_33 = arith.constant 16 : index
    %c0_34 = arith.constant 0 : index
    %72 = vector.load %arg8[%c16_33, %c0_34] : memref<36x256xf32, #tpu.memory_space<vmem>>, vector<4x256xf32>
    tpu.vector_store %arg8[%c16_33, %c0_34], %51 {strides = array<i32>} : memref<36x256xf32, #tpu.memory_space<vmem>>, vector<4x256xf32>,
    %c255_i32_35 = arith.constant 255 : i32
    %73 = tpu.dynamic_rotate %51 by %c255_i32_35 dim 1 : vector<4x256xf32>, i32 -> vector<4x256xf32>
    %74 = vector.extract_strided_slice %1 {offsets = [5, 0], sizes = [1, 256], strides = [1, 1]} : vector<9x256xf32> to vector<1x256xf32>
    %75 = vector.broadcast %74 : vector<1x256xf32> to vector<4x256xf32>
    %76 = arith.mulf %73, %75 : vector<4x256xf32>
    %c20_36 = arith.constant 20 : index
    %c0_37 = arith.constant 0 : index
    %77 = vector.load %arg8[%c20_36, %c0_37] : memref<36x256xf32, #tpu.memory_space<vmem>>, vector<4x256xf32>
    tpu.vector_store %arg8[%c20_36, %c0_37], %76 {strides = array<i32>} : memref<36x256xf32, #tpu.memory_space<vmem>>, vector<4x256xf32>,
    %c241_i32_38 = arith.constant 241 : i32
    %78 = tpu.dynamic_rotate %51 by %c241_i32_38 dim 1 : vector<4x256xf32>, i32 -> vector<4x256xf32>
    %79 = vector.extract_strided_slice %1 {offsets = [6, 0], sizes = [1, 256], strides = [1, 1]} : vector<9x256xf32> to vector<1x256xf32>
    %80 = vector.broadcast %79 : vector<1x256xf32> to vector<4x256xf32>
    %81 = arith.mulf %78, %80 : vector<4x256xf32>
    %c24_39 = arith.constant 24 : index
    %c0_40 = arith.constant 0 : index
    %82 = vector.load %arg8[%c24_39, %c0_40] : memref<36x256xf32, #tpu.memory_space<vmem>>, vector<4x256xf32>
    tpu.vector_store %arg8[%c24_39, %c0_40], %81 {strides = array<i32>} : memref<36x256xf32, #tpu.memory_space<vmem>>, vector<4x256xf32>,
    %c240_i32_41 = arith.constant 240 : i32
    %83 = tpu.dynamic_rotate %51 by %c240_i32_41 dim 1 : vector<4x256xf32>, i32 -> vector<4x256xf32>
    %84 = vector.extract_strided_slice %1 {offsets = [7, 0], sizes = [1, 256], strides = [1, 1]} : vector<9x256xf32> to vector<1x256xf32>
    %85 = vector.broadcast %84 : vector<1x256xf32> to vector<4x256xf32>
    %86 = arith.mulf %83, %85 : vector<4x256xf32>
    %c28_42 = arith.constant 28 : index
    %c0_43 = arith.constant 0 : index
    %87 = vector.load %arg8[%c28_42, %c0_43] : memref<36x256xf32, #tpu.memory_space<vmem>>, vector<4x256xf32>
    tpu.vector_store %arg8[%c28_42, %c0_43], %86 {strides = array<i32>} : memref<36x256xf32, #tpu.memory_space<vmem>>, vector<4x256xf32>,
    %c239_i32_44 = arith.constant 239 : i32
    %88 = tpu.dynamic_rotate %51 by %c239_i32_44 dim 1 : vector<4x256xf32>, i32 -> vector<4x256xf32>
    %89 = vector.extract_strided_slice %1 {offsets = [8, 0], sizes = [1, 256], strides = [1, 1]} : vector<9x256xf32> to vector<1x256xf32>
    %90 = vector.broadcast %89 : vector<1x256xf32> to vector<4x256xf32>
    %91 = arith.mulf %88, %90 : vector<4x256xf32>
    %c32_45 = arith.constant 32 : index
    %c0_46 = arith.constant 0 : index
    %92 = vector.load %arg8[%c32_45, %c0_46] : memref<36x256xf32, #tpu.memory_space<vmem>>, vector<4x256xf32>
    tpu.vector_store %arg8[%c32_45, %c0_46], %91 {strides = array<i32>} : memref<36x256xf32, #tpu.memory_space<vmem>>, vector<4x256xf32>,
    %c0_47 = arith.constant 0 : index
    %c0_48 = arith.constant 0 : index
    %93 = vector.load %arg5[%c0_47, %c0_48] : memref<4x36xf32, #tpu.memory_space<vmem>>, vector<4x36xf32>
    %c0_49 = arith.constant 0 : index
    %c0_50 = arith.constant 0 : index
    %94 = vector.load %arg8[%c0_49, %c0_50] : memref<36x256xf32, #tpu.memory_space<vmem>>, vector<36x256xf32>
    %cst_51 = arith.constant dense<0.000000e+00> : vector<4x256xf32>
    %95 = tpu.matmul %93, %94, %cst_51 {dimension_numbers = #tpu.dot_dimension_numbers<[1], [0], [0], [1], [0, 0, 1, 1], [], []>, precision = #tpu.contract_precision<fp32>} : vector<4x36xf32>, vector<36x256xf32>, vector<4x256xf32> -> vector<4x256xf32>
    %c0_52 = arith.constant 0 : index
    %c0_53 = arith.constant 0 : index
    %96 = vector.load %arg6[%c0_52, %c0_53] : memref<4x1xf32, #tpu.memory_space<vmem>>, vector<4x1xf32>
    %97 = vector.broadcast %96 : vector<4x1xf32> to vector<4x256xf32>
    %98 = arith.addf %95, %97 : vector<4x256xf32>
    %99 = vector.shape_cast %0 : vector<1x4x256xf32> to vector<4x256xf32>
    %100 = arith.addf %99, %98 : vector<4x256xf32>
    %c0_54 = arith.constant 0 : index
    %c0_55 = arith.constant 0 : index
    %c0_56 = arith.constant 0 : index
    %101 = vector.load %arg7[%c0_54, %c0_55, %c0_56] : memref<1x4x256xf32, #tpu.memory_space<vmem>>, vector<1x4x256xf32>
    %102 = vector.shape_cast %101 : vector<1x4x256xf32> to vector<4x256xf32>
    %103 = vector.shape_cast %100 : vector<4x256xf32> to vector<1x4x256xf32>
    tpu.vector_store %arg7[%c0_54, %c0_55, %c0_56], %103 {strides = array<i32>} : memref<1x4x256xf32, #tpu.memory_space<vmem>>, vector<1x4x256xf32>,
    return
  }
  func.func @transform_0(%arg0: i32) -> (i32, i32, i32) {
    %c0_i32 = arith.constant 0 : i32
    %c0_i32_0 = arith.constant 0 : i32
    %c0_i32_1 = arith.constant 0 : i32
    return %arg0, %c0_i32, %c0_i32_0 : i32, i32, i32
  }
  func.func @transform_1(%arg0: i32) -> (i32, i32) {
    %c0_i32 = arith.constant 0 : i32
    %c0_i32_0 = arith.constant 0 : i32
    %c0_i32_1 = arith.constant 0 : i32
    return %c0_i32, %c0_i32_0 : i32, i32
  }
  func.func @transform_2(%arg0: i32) -> (i32, i32) {
    %c0_i32 = arith.constant 0 : i32
    %c0_i32_0 = arith.constant 0 : i32
    %c0_i32_1 = arith.constant 0 : i32
    return %c0_i32, %c0_i32_0 : i32, i32
  }
  func.func @transform_3(%arg0: i32) -> (i32, i32) {
    %c0_i32 = arith.constant 0 : i32
    %c0_i32_0 = arith.constant 0 : i32
    %c0_i32_1 = arith.constant 0 : i32
    return %c0_i32, %c0_i32_0 : i32, i32
  }
  func.func @transform_4(%arg0: i32) -> (i32, i32) {
    %c0_i32 = arith.constant 0 : i32
    %c0_i32_0 = arith.constant 0 : i32
    %c0_i32_1 = arith.constant 0 : i32
    return %c0_i32, %c0_i32_0 : i32, i32
  }
  func.func @transform_5(%arg0: i32) -> (i32, i32) {
    %c0_i32 = arith.constant 0 : i32
    %c0_i32_0 = arith.constant 0 : i32
    %c0_i32_1 = arith.constant 0 : i32
    return %c0_i32, %c0_i32_0 : i32, i32
  }
  func.func @transform_6(%arg0: i32) -> (i32, i32, i32) {
    %c0_i32 = arith.constant 0 : i32
    %c0_i32_0 = arith.constant 0 : i32
    %c0_i32_1 = arith.constant 0 : i32
    return %arg0, %c0_i32, %c0_i32_0 : i32, i32, i32
  }
}

</mosaic_0001>

<bundles_post_ra>
// kernel: residual_block.1
= control target key start
LH: loop header
LB: loop body
LE: loop exit
PB: predicated region body
PF: predicated region fallthrough
CT: control target
= control target key end

     0   :  { %s1889_s21 = smov 0   ;;  %s2424_s0 = inlined_call_operand.vmem [shape: f32[2,4,256], index: 0, kind: input, shape index: {}]   ;;  %s2425_s1 = inlined_call_operand.vmem [shape: f32[9,256], index: 1, kind: input, shape index: {}]   ;;  %s2426_s2 = inlined_call_operand.vmem [shape: f32[4,36], index: 2, kind: input, shape index: {}]   ;;  %s2427_s3 = inlined_call_operand.vmem [shape: f32[4,1], index: 3, kind: input, shape index: {}]   ;;  %s2428_s4 = inlined_call_operand.vmem [shape: f32[4,36], index: 4, kind: input, shape index: {}]   ;;  %s2429_s5 = inlined_call_operand.vmem [shape: f32[4,1], index: 5, kind: input, shape index: {}]   ;;  %s2430_s6 = inlined_call_operand.vmem [shape: f32[2,4,256], index: 6, kind: output, shape index: {}]  }
   0x1 LB: > { %s1801_s22 = sadd.s32 4294967295, %s1842_s21   ;;  %p1805_p0 = scmp.ge.s32.totalorder %s1842_s21, 1  ;;  %s1842_s21 = sphi %s1889_s21, %s16_s21  }
   0x2   : > { %p212_p1 = scmp.lt.s32.totalorder %s1842_s21, 3 }
   0x4   : > { %p213_p2 = pnand %p1805_p0, %p212_p1 }
   0x5   : > { %p242_p3 = scmp.lt.s32.totalorder (!%p213_p2), %s1801_s22, 1  ;;  %s1844_s27 = smov (!%p213_p2), 112  }
   0x6   : > { %216 = sbr.rel (%p213_p2) target bundleno = 796 (0x31c), region = 44  ;;  %s1845_s28 = smov (!%p213_p2), 111  }
   0x7   : > { %s1846_s29 = smov (!%p213_p2), 127   ;;  %s1847_s30 = smov (!%p213_p2), 113  }
   0x8   : > { %s1848_s7 = smov (!%p213_p2), 1   ;;  %s1849_s8 = smov (!%p213_p2), 16  }
   0x9   : > { %s1850_s9 = smov (!%p213_p2), 15   ;;  %s1851_s10 = smov (!%p213_p2), 17  }
   0xb   : > { %s2432_s22 = smov (!%p242_p3, %s1801_s22), 1  ;;  %v1852_v2 = vmov 0.0   ;;  %v451_v3 = vld [vmem:[%s2427_s3] sm:$0xf]  ;;  %v1853_v4 = vmov 0   ;;  %v264_v5 = vlaneseq  ;;  %v1952_v10 = vld [vmem:[%s2425_s1 + $0x8] sm:$0xff] }
   0xc   : > { %s1814_s23 = sshll.u32 %s2432_s22, 3  ;;  %542 = vmatprep.mubr.f32.mxu0 %v1852_v2  ;;  %668 = vmatprep.mubr.f32.mxu1 %v1852_v2  ;;  %v1947_v9 = vld [vmem:[%s2425_s1] sm:$0xff]  ;;  %v1980_v25 = vld [vmem:[%s2425_s1 + $0x10] ss:$0 sm:$0xff]  ;;  %v1985_v26 = vld [vmem:[%s2425_s1 + $0x18] ss:$0 sm:$0xff] }
   0xd   : > { %s246_s26 = scalar_lea.vmem %s2424_s0, %s1814_s23  ;;  %1834 = vset.pattern.permute.xlu0 %v1853_v4  ;;  %v1939_v6 = vshrl.u32 %v264_v5, 7  ;;  %v1941_v7 = vand.u32 127, %v264_v5  ;;  %v440_v46 = vld [vmem:[%s2426_s2] sm:$0xf]  ;;  %vm457_vm4 = vcmask 293888   ;;  %vm461_vm7 = vcmask 1043456  }
   0xe   : > { %v1905_v0 = vld [vmem:[%s246_s26] sm:$0xff]  ;;  %v459_v56 = vsel %vm457_vm4, %v440_v46, 0 }
   0xf   : > { %396 = vrot.lane.b32.xlu1 %v1905_v0, %s1844_s27  ;;  %350 = vst [vmem:[#allocation2 + $0x48] sm:$0xf] %v1905_v0  ;;  %421 = vrot.lane.b32.xlu0 %v1905_v0, %s1845_s28  ;;  %v258_v1 = vcombine.high %v1905_v0, %v1905_v0  ;;  %v405_v8 = vsub.s32 7, %v1939_v6  ;;  %vm400_vm0 = vcmp.lt.s32.totalorder %v1941_v7, 112  ;;  %v361_v15 = vsub.s32 5, %v1939_v6 }
  0x10   : > { %v386_v16 = vsub.s32 6, %v1939_v6  ;;  %vm356_vm1 = vcmp.lt.s32.totalorder %v1941_v7, 127  ;;  %vm425_vm2 = vcmp.lt.s32.totalorder %v1941_v7, 111  ;;  %vm381_vm3 = vcmp.lt.s32.totalorder %v1941_v7, 113 }
  0x11   : > { %351 = vst [vmem:[#allocation2 + $0x28] sm:$0xf] %v258_v1  ;;  %v1956_v13 = vrot.slane %v1947_v9, %v405_v8  ;;  %v1959_v14 = vrot.slane %v1952_v10, %v405_v8  ;;  %v1972_v23 = vrot.slane %v1947_v9, %v361_v15  ;;  %v1975_v24 = vrot.slane %v1952_v10, %v361_v15 }
  0x12   : > { %v1989_v27 = vrot.slane %v1947_v9, %v386_v16  ;;  %v1992_v32 = vrot.slane %v1952_v10, %v386_v16  ;;  %v334_v33 = vsub.s32 3, %v1939_v6  ;;  %vm329_vm5 = vcmp.lt.s32.totalorder %v1941_v7, 1 }
  0x13   : > { %352 = vrot.lane.b32.xlu0 %v1905_v0, %s1846_s29  ;;  %398 = vrot.lane.b32.xlu1 %v258_v1, %s1844_s27  ;;  %v290_v49 = vsub.s32 1, %v1939_v6  ;;  %v315_v54 = vsub.s32 2, %v1939_v6  ;;  %v271_v55 = vsub.s32 0, %v1939_v6  ;;  %vm285_vm6 = vcmp.lt.s32.totalorder %v1941_v7, 16 }
  0x14   : > { %v2019_v52 = vrot.slane %v1947_v9, %v334_v33  ;;  %v2022_v53 = vrot.slane %v1952_v10, %v334_v33  ;;  %vm310_vm8 = vcmp.lt.s32.totalorder %v1941_v7, 15  ;;  %vm266_vm9 = vcmp.lt.s32.totalorder %v1941_v7, 17 }
  0x15   : > { %v2033_v61 = vrot.slane %v1947_v9, %v290_v49  ;;  %v2036_v62 = vrot.slane %v1952_v10, %v290_v49  ;;  %v2044_v6 = vrot.slane %v1947_v9, %v315_v54  ;;  %v2047_v8 = vrot.slane %v1952_v10, %v315_v54 }
  0x16   : > { %v2066_v33 = vrot.slane %v1952_v10, %v271_v55 }
  0x17   : > { %354 = vrot.lane.b32.xlu1 %v258_v1, %s1846_s29  ;;  %423 = vrot.lane.b32.xlu0 %v258_v1, %s1845_s28 }
  0x1b   : > { %379 = vrot.lane.b32.xlu1 %v258_v1, %s1847_s30  ;;  %377 = vrot.lane.b32.xlu0 %v1905_v0, %s1847_s30 }
  0x1f   : > { %327 = vrot.lane.b32.xlu1 %v258_v1, %s1848_s7  ;;  %325 = vrot.lane.b32.xlu0 %v1905_v0, %s1848_s7 }
  0x23   : > { %283 = vrot.lane.b32.xlu1 %v258_v1, %s1849_s8  ;;  %281 = vrot.lane.b32.xlu0 %v1905_v0, %s1849_s8 }
  0x27   : > { %308 = vrot.lane.b32.xlu1 %v258_v1, %s1850_s9  ;;  %306 = vrot.lane.b32.xlu0 %v1905_v0, %s1850_s9 }
  0x2b   : > { %262 = vrot.lane.b32.xlu1 %v258_v1, %s1851_s10  ;;  %260 = vrot.lane.b32.xlu0 %v1905_v0, %s1851_s10 }
  0x2f   : > { %454 = vperm.xlu0 %1834, %v451_v3   ;;  %v2041_v3 = vand.u32 4294901760, %v459_v56 }
  0x81   : > { %v397_v11 = vpop.permute.xlu1 %396  ;;  %v422_v12 = vpop.permute.xlu0 %421 }
  0x85   : > { %v353_v17 = vpop.permute.xlu0 %352  ;;  %v399_v18 = vpop.permute.xlu1 %398 }
  0x86   : > { %v401_v19 = vsel %vm400_vm0, %v397_v11, %v399_v18  ;;  %v402_v20 = vsel %vm400_vm0, %v399_v18, %v397_v11  ;;  %v2051_v11 = vrot.slane %v1947_v9, %v271_v55 }
  0x87   : > { %v411_v21 = vmul.f32 %v1956_v13, %v401_v19  ;;  %v412_v22 = vmul.f32 %v1959_v14, %v402_v20 }
  0x89   : > { %v415_v28 = vrot.slane %v411_v21, 4  ;;  %v416_v29 = vrot.slane %v412_v22, 4  ;;  %v355_v30 = vpop.permute.xlu1 %354  ;;  %v424_v31 = vpop.permute.xlu0 %423 }
  0x8a   : > { %v357_v34 = vsel %vm356_vm1, %v353_v17, %v355_v30  ;;  %v358_v35 = vsel %vm356_vm1, %v355_v30, %v353_v17  ;;  %v426_v36 = vsel %vm425_vm2, %v422_v12, %v424_v31  ;;  %v427_v37 = vsel %vm425_vm2, %v424_v31, %v422_v12 }
  0x8b   : > { %419 = vst [vmem:[#allocation2 + $0x8] sm:$0xf0] %v415_v28  ;;  %420 = vst [vmem:[#allocation2 + $0x20] sm:$0xf0] %v416_v29  ;;  %v367_v38 = vmul.f32 %v1972_v23, %v357_v34  ;;  %v368_v39 = vmul.f32 %v1975_v24, %v358_v35  ;;  %v436_v40 = vmul.f32 %v1980_v25, %v426_v36 }
  0x8c   : > { %v437_v41 = vmul.f32 %v1985_v26, %v427_v37  ;;  %v2069_v34 = vsub.f32 %v459_v56, %v2041_v3 }
  0x8d   : > { %v371_v42 = vrot.slane %v367_v38, 4  ;;  %v372_v43 = vrot.slane %v368_v39, 4  ;;  %438 = vst [vmem:[#allocation2 + $0x40] sm:$0xf] %v436_v40  ;;  %v380_v44 = vpop.permute.xlu1 %379  ;;  %v378_v45 = vpop.permute.xlu0 %377 }
  0x8e   : > { %439 = vst [vmem:[#allocation2 + $0x38] sm:$0xf] %v437_v41  ;;  %v382_v47 = vsel %vm381_vm3, %v378_v45, %v380_v44  ;;  %v383_v48 = vsel %vm381_vm3, %v380_v44, %v378_v45 }
  0x8f   : > { %375 = vst [vmem:[#allocation2 + $0x48] sm:$0xf0] %v371_v42  ;;  %376 = vst [vmem:[#allocation2 + $0x28] sm:$0xf0] %v372_v43  ;;  %v392_v50 = vmul.f32 %v1989_v27, %v382_v47  ;;  %v393_v51 = vmul.f32 %v1992_v32, %v383_v48 }
  0x91   : > { %394 = vst [vmem:[#allocation2 + $0x8] sm:$0xf] %v392_v50  ;;  %395 = vst [vmem:[#allocation2 + $0x20] sm:$0xf] %v393_v51  ;;  %v328_v57 = vpop.permute.xlu1 %327  ;;  %v326_v58 = vpop.permute.xlu0 %325 }
  0x92   : > { %v330_v59 = vsel %vm329_vm5, %v326_v58, %v328_v57  ;;  %v331_v60 = vsel %vm329_vm5, %v328_v57, %v326_v58 }
  0x93   : > { %v340_v63 = vmul.f32 %v2019_v52, %v331_v60  ;;  %v341_v1 = vmul.f32 %v2022_v53, %v330_v59 }
  0x94   : > { %v449_v5 = vld [vmem:[#allocation2 + $0x40] sm:$0xf] }
  0x95   : > { %v450_v4 = vld [vmem:[#allocation2 + $0x38] sm:$0xf]  ;;  %v344_v12 = vrot.slane %v340_v63, 4  ;;  %v345_v15 = vrot.slane %v341_v1, 4  ;;  %v284_v16 = vpop.permute.xlu1 %283  ;;  %v282_v17 = vpop.permute.xlu0 %281  ;;  %v463_v19 = vsel %vm461_vm7, %v449_v5, 0 }
  0x96   : > { %v466_v18 = vsel %vm461_vm7, %v450_v4, 0  ;;  %v286_v20 = vsel %vm285_vm6, %v282_v17, %v284_v16  ;;  %v287_v21 = vsel %vm285_vm6, %v284_v16, %v282_v17  ;;  %v2061_v28 = vand.u32 4294901760, %v463_v19  ;;  %v446_v9 = vld [vmem:[#allocation2 + $0x28] sm:$0xff] }
  0x97   : > { %v2059_v22 = vand.u32 4294901760, %v466_v18  ;;  %v445_v29 = vld [vmem:[#allocation2 + $0x48] sm:$0xff]  ;;  %348 = vst [vmem:[#allocation2 + $0x18] sm:$0xf0] %v344_v12  ;;  %349 = vst [vmem:[#allocation2 + $0x10] sm:$0xf0] %v345_v15  ;;  %v296_v30 = vmul.f32 %v2033_v61, %v287_v21  ;;  %v297_v31 = vmul.f32 %v2036_v62, %v286_v20 }
  0x98   : > { %v448_v35 = vld [vmem:[#allocation2 + $0x20] sm:$0xff]  ;;  %v447_v36 = vld [vmem:[#allocation2 + $0x8] sm:$0xff]  ;;  %v2072_v37 = vand.u32 4294901760, %v446_v9  ;;  %v2074_v38 = vand.u32 4294901760, %v445_v29  ;;  %v2080_v40 = vsub.f32 %v463_v19, %v2061_v28 }
  0x99   : > { %491 = vmatprep.subr.mxu0 %v2059_v22  ;;  %v2077_v39 = vsub.f32 %v466_v18, %v2059_v22  ;;  %v300_v41 = vrot.slane %v296_v30, 4  ;;  %v301_v10 = vrot.slane %v297_v31, 4  ;;  %v309_v42 = vpop.permute.xlu1 %308  ;;  %v307_v43 = vpop.permute.xlu0 %306  ;;  %v2083_v44 = vand.u32 4294901760, %v448_v35 }
  0x9a   : > { %493 = vmatpush1.msra.mxu0 %v2061_v28  ;;  %v2085_v45 = vand.u32 4294901760, %v447_v36  ;;  %v311_v46 = vsel %vm310_vm8, %v307_v43, %v309_v42  ;;  %v312_v47 = vsel %vm310_vm8, %v309_v42, %v307_v43  ;;  %v584_v49 = vand.u32 4294901760, %v2080_v40 }
  0x9b   : > { %v578_v48 = vand.u32 4294901760, %v2077_v39  ;;  %304 = vst [vmem:[#allocation2 + $0x30] sm:$0xf0] %v300_v41  ;;  %305 = vst [vmem:[#allocation2] sm:$0xf0] %v301_v10  ;;  %v321_v50 = vmul.f32 %v2044_v6, %v312_v47  ;;  %v322_v51 = vmul.f32 %v2047_v8, %v311_v46  ;;  %495 = vmatprep.subr.mxu0 %v2083_v44 }
  0x9c   : > { %v2097_v54 = vsub.f32 %v448_v35, %v2083_v44  ;;  %v2100_v55 = vsub.f32 %v447_v36, %v2085_v45  ;;  %497 = vmatpush1.msra.mxu0 %v2085_v45  ;;  %v585_v57 = vsub.f32 %v2080_v40, %v584_v49  ;;  %v2110_v58 = vsub.f32 %v446_v9, %v2072_v37 }
  0x9d   : > { %v579_v56 = vsub.f32 %v2077_v39, %v578_v48  ;;  %v2113_v59 = vsub.f32 %v445_v29, %v2074_v38  ;;  %323 = vst [vmem:[#allocation2 + $0x18] sm:$0xf] %v321_v50  ;;  %324 = vst [vmem:[#allocation2 + $0x10] sm:$0xf] %v322_v51  ;;  %v263_v60 = vpop.permute.xlu1 %262  ;;  %v261_v63 = vpop.permute.xlu0 %260  ;;  %499 = vmatprep.subr.mxu0 %v2072_v37  ;;  %v545_v29 = vand.u32 4294901760, %v2069_v34 }
  0x9e   : > { %v590_v1 = vand.u32 4294901760, %v2097_v54  ;;  %v596_v4 = vand.u32 4294901760, %v2100_v55  ;;  %v267_v5 = vsel %vm266_vm9, %v261_v63, %v263_v60  ;;  %v268_v12 = vsel %vm266_vm9, %v263_v60, %v261_v63  ;;  %501 = vmatpush1.msra.mxu0 %v2074_v38 }
  0x9f   : > { %v580_v15 = vand.u32 4294901760, %v579_v56  ;;  %v586_v16 = vand.u32 4294901760, %v585_v57  ;;  %v277_v17 = vmul.f32 %v2051_v11, %v268_v12  ;;  %v278_v18 = vmul.f32 %v2066_v33, %v267_v5 }
  0xa0   : > { %v591_v19 = vsub.f32 %v2097_v54, %v590_v1  ;;  %v597_v20 = vsub.f32 %v2100_v55, %v596_v4  ;;  %v602_v21 = vand.u32 4294901760, %v2110_v58  ;;  %v608_v9 = vand.u32 4294901760, %v2113_v59 }
  0xa1   : > { %581 = vmatprep.subr.mxu1 %v580_v15  ;;  %279 = vst [vmem:[#allocation2 + $0x30] sm:$0xf] %v277_v17  ;;  %280 = vst [vmem:[#allocation2] sm:$0xf] %v278_v18  ;;  %v546_v43 = vsub.f32 %v2069_v34, %v545_v29 }
  0xa2   : > { %587 = vmatpush1.msra.mxu1 %v586_v16  ;;  %v592_v30 = vand.u32 4294901760, %v591_v19  ;;  %v598_v31 = vand.u32 4294901760, %v597_v20  ;;  %v603_v35 = vsub.f32 %v2110_v58, %v602_v21  ;;  %v609_v36 = vsub.f32 %v2113_v59, %v608_v9 }
  0xa3   : > { %v547_v63 = vand.u32 4294901760, %v546_v43 }
  0xa4   : > { %593 = vmatprep.subr.mxu1 %v592_v30  ;;  %v604_v41 = vand.u32 4294901760, %v603_v35  ;;  %v444_v10 = vld [vmem:[#allocation2 + $0x10] sm:$0xff]  ;;  %v443_v42 = vld [vmem:[#allocation2 + $0x18] sm:$0xff]  ;;  %v610_v46 = vand.u32 4294901760, %v609_v36 }
  0xa5   : > { %599 = vmatpush1.msra.mxu1 %v598_v31  ;;  %v2143_v47 = vand.u32 4294901760, %v444_v10  ;;  %v2145_v50 = vand.u32 4294901760, %v443_v42 }
  0xa6   : > { %605 = vmatprep.subr.mxu1 %v604_v41 }
  0xa7   : > { %611 = vmatpush1.msra.mxu1 %v610_v46  ;;  %503 = vmatprep.subr.mxu0 %v2143_v47  ;;  %v613_v51 = vsub.f32 %v444_v10, %v2143_v47  ;;  %v619_v56 = vsub.f32 %v443_v42, %v2145_v50 }
  0xa8   : > { %505 = vmatpush1.msra.mxu0 %v2145_v50  ;;  %v442_v57 = vld [vmem:[#allocation2] sm:$0xff]  ;;  %v441_v60 = vld [vmem:[#allocation2 + $0x30] sm:$0xff] }
  0xa9   : > { %v2151_v5 = vand.u32 4294901760, %v442_v57  ;;  %v2153_v12 = vand.u32 4294901760, %v441_v60  ;;  %v614_v15 = vand.u32 4294901760, %v613_v51  ;;  %v620_v16 = vand.u32 4294901760, %v619_v56 }
  0xab   : > { %507 = vmatprep.subr.mxu0 %v2151_v5  ;;  %v615_v17 = vsub.f32 %v613_v51, %v614_v15  ;;  %v621_v18 = vsub.f32 %v619_v56, %v620_v16  ;;  %v625_v19 = vsub.f32 %v442_v57, %v2151_v5  ;;  %v631_v20 = vsub.f32 %v441_v60, %v2153_v12  ;;  %v1156_v60 = vld [vmem:[%s2429_s5] sm:$0xf] }
  0xac   : > { %509 = vmatpush1.msra.mxu0 %v2153_v12 }
  0xad   : > { %700 = vmatprep.subr.mxu0 %v2077_v39  ;;  %548 = vmatmul.mubr.f32.vlgmr.msra.gmra.mxu0 %v547_v63  ;;  %v616_v30 = vand.u32 4294901760, %v615_v17  ;;  %v622_v31 = vand.u32 4294901760, %v621_v18  ;;  %v626_v35 = vand.u32 4294901760, %v625_v19  ;;  %v632_v36 = vand.u32 4294901760, %v631_v20 }
  0xae   : > { %703 = vmatpush1.msra.mxu0 %v2080_v40  ;;  %760 = vmatprep.mubr.f32.mxu0 %v1852_v2 }
  0xaf   : > { %617 = vmatprep.subr.mxu1 %v616_v30  ;;  %706 = vmatprep.subr.mxu0 %v2097_v54  ;;  %v627_v41 = vsub.f32 %v625_v19, %v626_v35  ;;  %v633_v10 = vsub.f32 %v631_v20, %v632_v36 }
  0xb0   : > { %623 = vmatpush1.msra.mxu1 %v622_v31  ;;  %709 = vmatpush1.msra.mxu0 %v2100_v55 }
  0xb1   : > { %712 = vmatprep.subr.mxu0 %v2110_v58  ;;  %v628_v42 = vand.u32 4294901760, %v627_v41  ;;  %v634_v43 = vand.u32 4294901760, %v633_v10 }
  0xb2   : > { %715 = vmatpush1.msra.mxu0 %v2113_v59 }
  0xb3   : > { %629 = vmatprep.subr.mxu1 %v628_v42  ;;  %718 = vmatprep.subr.mxu0 %v613_v51 }
  0xb4   : > { %635 = vmatpush1.msra.mxu1 %v634_v43  ;;  %721 = vmatpush1.msra.mxu0 %v619_v56 }
  0xb5   : > { %670 = vmatmul.mubr.f32.vlgmr.msra.gmra.mxu1 %v2041_v3  ;;  %724 = vmatprep.subr.mxu0 %v625_v19 }
  0xb6   : > { %792 = vmatprep.subr.mxu1 %v2059_v22  ;;  %727 = vmatpush1.msra.mxu0 %v631_v20 }
  0xb7   : > { %794 = vmatpush1.msra.mxu1 %v2061_v28  ;;  %763 = vmatmul.mubr.f32.vlgmr.msra.gmra.mxu0 %v2069_v34 }
  0xb8   : > { %796 = vmatprep.subr.mxu1 %v2083_v44  ;;  %878 = vmatprep.subr.mxu0 %v578_v48 }
  0xb9   : > { %798 = vmatpush1.msra.mxu1 %v2085_v45  ;;  %882 = vmatpush1.msra.mxu0 %v584_v49 }
  0xba   : > { %800 = vmatprep.subr.mxu1 %v2072_v37  ;;  %886 = vmatprep.subr.mxu0 %v590_v1 }
  0xbb   : > { %802 = vmatpush1.msra.mxu1 %v2074_v38  ;;  %890 = vmatpush1.msra.mxu0 %v596_v4 }
  0xbc   : > { %804 = vmatprep.subr.mxu1 %v2143_v47  ;;  %894 = vmatprep.subr.mxu0 %v602_v21 }
  0xbd   : > { %806 = vmatpush1.msra.mxu1 %v2145_v50  ;;  %898 = vmatpush1.msra.mxu0 %v608_v9 }
  0xbe   : > { %808 = vmatprep.subr.mxu1 %v2151_v5  ;;  %902 = vmatprep.subr.mxu0 %v614_v15 }
  0xbf   : > { %810 = vmatpush1.msra.mxu1 %v2153_v12  ;;  %843 = vmatprep.mubr.f32.mxu1 %v1852_v2 }
  0xc0   : > { %906 = vmatpush1.msra.mxu0 %v620_v16  ;;  %847 = vmatmul.mubr.f32.vlgmr.msra.gmra.mxu1 %v545_v29 }
  0xc1   : > { %910 = vmatprep.subr.mxu0 %v626_v35  ;;  %978 = vmatprep.subr.mxu1 %v2059_v22 }
  0xc2   : > { %914 = vmatpush1.msra.mxu0 %v632_v36  ;;  %947 = vmatprep.mubr.f32.mxu0 %v1852_v2 }
  0xc3   : > { %980 = vmatpush1.msra.mxu1 %v2061_v28  ;;  %949 = vmatmul.mubr.f32.vlgmr.msra.gmra.mxu0 %v2041_v3  ;;  %v455_v28 = vpop.permute.xlu0 %454 }
  0xc4   : > { %982 = vmatprep.subr.mxu1 %v2083_v44  ;;  %1029 = vmatprep.mubr.f32.mxu1 %v1852_v2 }
  0xc5   : > { %984 = vmatpush1.msra.mxu1 %v2085_v45  ;;  %1245 = vmatprep.mubr.f32.mxu0 %v1852_v2 }
  0xc6   : > { %986 = vmatprep.subr.mxu1 %v2072_v37 }
  0xc7   : > { %988 = vmatpush1.msra.mxu1 %v2074_v38 }
  0xc8   : > { %990 = vmatprep.subr.mxu1 %v2143_v47 }
  0xc9   : > { %992 = vmatpush1.msra.mxu1 %v2145_v50 }
  0xca   : > { %994 = vmatprep.subr.mxu1 %v2151_v5 }
  0xcb   : > { %996 = vmatpush1.msra.mxu1 %v2153_v12 }
  0xcc   : > { %1031 = vmatmul.mubr.f32.vlgmr.msra.gmra.mxu1 %v2041_v3 }
  0xcd   : > { %1371 = vmatprep.mubr.f32.mxu1 %v1852_v2 }
 0x16d   : > { %v549_v22 = vpop.f32.mrf.mxu0 }
 0x16e   : > { %v550_v40 = vadd.f32 %v549_v22, %v455_v28 }
 0x16f   : > { %v551_v34 = vpop.f32.mrf.mxu0 }
 0x170   : > { %v552_v37 = vadd.f32 %v551_v34, %v455_v28 }
 0x175   : > { %v671_v39 = vpop.f32.mrf.mxu1 }
 0x176   : > { %v672_v45 = vadd.f32 %v671_v39, %v550_v40 }
 0x177   : > { %v673_v44 = vpop.f32.mrf.mxu1  ;;  %v764_v38 = vpop.f32.mrf.mxu0 }
 0x178   : > { %v674_v49 = vadd.f32 %v673_v44, %v552_v37  ;;  %v765_v55 = vadd.f32 %v764_v38, %v672_v45 }
 0x179   : > { %v766_v54 = vpop.f32.mrf.mxu0 }
 0x17a   : > { %v767_v1 = vadd.f32 %v766_v54, %v674_v49 }
 0x180   : > { %v848_v48 = vpop.f32.mrf.mxu1 }
 0x181   : > { %v849_v4 = vadd.f32 %v848_v48, %v765_v55 }
 0x182   : > { %v850_v58 = vpop.f32.mrf.mxu1 }
 0x183   : > { %v950_v59 = vpop.f32.mrf.mxu0  ;;  %v851_v3 = vadd.f32 %v850_v58, %v767_v1 }
 0x184   : > { %v951_v9 = vadd.f32 %v950_v59, %v849_v4 }
 0x185   : > { %v952_v21 = vpop.f32.mrf.mxu0 }
 0x186   : > { %v953_v46 = vadd.f32 %v952_v21, %v851_v3 }
 0x18c   : > { %v1032_v29 = vpop.f32.mrf.mxu1 }
 0x18d   : > { %v1033_v47 = vadd.f32 %v1032_v29, %v951_v9 }
 0x18e   : > { %v1034_v50 = vpop.f32.mrf.mxu1 }
 0x18f   : > { %v1037_v51 = vmax.f32 %v1033_v47, 0.0  ;;  %v1035_v56 = vadd.f32 %v1034_v50, %v953_v46 }
 0x191   : > { %1091 = vst [vmem:[#allocation2 + $0x48] sm:$0xf] %v1037_v51  ;;  %v1038_v57 = vmax.f32 %v1035_v56, 0.0  ;;  %1119 = vrot.lane.b32.xlu0 %v1037_v51, %s1844_s27  ;;  %1135 = vrot.lane.b32.xlu1 %v1037_v51, %s1845_s28 }
 0x193   : > { %1092 = vst [vmem:[#allocation2 + $0x28] sm:$0xf] %v1038_v57 }
 0x195   : > { %1093 = vrot.lane.b32.xlu0 %v1037_v51, %s1846_s29  ;;  %1137 = vrot.lane.b32.xlu1 %v1038_v57, %s1845_s28 }
 0x199   : > { %1109 = vrot.lane.b32.xlu0 %v1037_v51, %s1847_s30  ;;  %1121 = vrot.lane.b32.xlu1 %v1038_v57, %s1844_s27 }
 0x19d   : > { %1075 = vrot.lane.b32.xlu0 %v1037_v51, %s1848_s7  ;;  %1095 = vrot.lane.b32.xlu1 %v1038_v57, %s1846_s29 }
 0x1a1   : > { %1049 = vrot.lane.b32.xlu0 %v1037_v51, %s1849_s8  ;;  %1111 = vrot.lane.b32.xlu1 %v1038_v57, %s1847_s30 }
 0x1a5   : > { %1065 = vrot.lane.b32.xlu0 %v1037_v51, %s1850_s9  ;;  %1077 = vrot.lane.b32.xlu1 %v1038_v57, %s1848_s7 }
 0x1a9   : > { %1039 = vrot.lane.b32.xlu0 %v1037_v51, %s1851_s10  ;;  %1051 = vrot.lane.b32.xlu1 %v1038_v57, %s1849_s8  ;;  %s251_s8 = scalar_lea.vmem %s2430_s6, %s1814_s23 }
 0x1ad   : > { %1159 = vperm.xlu0 %1834, %v1156_v60   ;;  %1067 = vrot.lane.b32.xlu1 %v1038_v57, %s1850_s9 }
 0x1b1   : > { %1041 = vrot.lane.b32.xlu1 %v1038_v57, %s1851_s10 }
 0x203   : > { %v1120_v63 = vpop.permute.xlu0 %1119  ;;  %v1136_v5 = vpop.permute.xlu1 %1135 }
 0x207   : > { %v1094_v12 = vpop.permute.xlu0 %1093  ;;  %v1138_v15 = vpop.permute.xlu1 %1137 }
 0x208   : > { %v1139_v16 = vsel %vm425_vm2, %v1136_v5, %v1138_v15  ;;  %v1140_v17 = vsel %vm425_vm2, %v1138_v15, %v1136_v5 }
 0x209   : > { %v1141_v18 = vmul.f32 %v1980_v25, %v1139_v16  ;;  %v1142_v19 = vmul.f32 %v1985_v26, %v1140_v17 }
 0x20b   : > { %1143 = vst [vmem:[#allocation2 + $0x40] sm:$0xf] %v1141_v18  ;;  %1144 = vst [vmem:[#allocation2 + $0x38] sm:$0xf] %v1142_v19  ;;  %v1110_v20 = vpop.permute.xlu0 %1109  ;;  %v1122_v30 = vpop.permute.xlu1 %1121 }
 0x20c   : > { %v1123_v31 = vsel %vm400_vm0, %v1120_v63, %v1122_v30  ;;  %v1124_v35 = vsel %vm400_vm0, %v1122_v30, %v1120_v63 }
 0x20d   : > { %v1125_v36 = vmul.f32 %v1123_v31, %v1956_v13  ;;  %v1126_v41 = vmul.f32 %v1124_v35, %v1959_v14 }
 0x20f   : > { %v1129_v10 = vrot.slane %v1125_v36, 4  ;;  %v1130_v42 = vrot.slane %v1126_v41, 4  ;;  %v1096_v43 = vpop.permute.xlu1 %1095  ;;  %v1076_v22 = vpop.permute.xlu0 %1075 }
 0x210   : > { %v1097_v25 = vsel %vm356_vm1, %v1094_v12, %v1096_v43  ;;  %v1098_v26 = vsel %vm356_vm1, %v1096_v43, %v1094_v12 }
 0x211   : > { %1133 = vst [vmem:[#allocation2 + $0x8] sm:$0xf0] %v1129_v10  ;;  %1134 = vst [vmem:[#allocation2 + $0x20] sm:$0xf0] %v1130_v42  ;;  %v1099_v28 = vmul.f32 %v1097_v25, %v1972_v23  ;;  %v1100_v34 = vmul.f32 %v1098_v26, %v1975_v24 }
 0x212   : > { %v1155_v39 = vld [vmem:[#allocation2 + $0x38] sm:$0xf]  ;;  %v1154_v13 = vld [vmem:[#allocation2 + $0x40] sm:$0xf] }
 0x213   : > { %v1103_v40 = vrot.slane %v1099_v28, 4  ;;  %v1104_v14 = vrot.slane %v1100_v34, 4  ;;  %v1112_v37 = vpop.permute.xlu1 %1111  ;;  %v1169_v44 = vsel %vm461_vm7, %v1155_v39, 0  ;;  %v1166_v38 = vsel %vm461_vm7, %v1154_v13, 0  ;;  %v1050_v59 = vpop.permute.xlu0 %1049 }
 0x214   : > { %v1113_v45 = vsel %vm381_vm3, %v1110_v20, %v1112_v37  ;;  %v1114_v48 = vsel %vm381_vm3, %v1112_v37, %v1110_v20  ;;  %v2252_v49 = vand.u32 4294901760, %v1169_v44  ;;  %v2254_v23 = vand.u32 4294901760, %v1166_v38 }
 0x215   : > { %1107 = vst [vmem:[#allocation2 + $0x48] sm:$0xf0] %v1103_v40  ;;  %1108 = vst [vmem:[#allocation2 + $0x28] sm:$0xf0] %v1104_v14  ;;  %v1115_v24 = vmul.f32 %v1113_v45, %v1989_v27  ;;  %v1116_v54 = vmul.f32 %v1114_v48, %v1992_v32  ;;  %v1145_v27 = vld [vmem:[%s2428_s4] sm:$0xf] }
 0x216   : > { %1194 = vmatprep.subr.mxu0 %v2252_v49  ;;  %v2260_v55 = vsub.f32 %v1166_v38, %v2254_v23  ;;  %v2263_v58 = vsub.f32 %v1169_v44, %v2252_v49  ;;  %v1163_v50 = vsel %vm457_vm4, %v1145_v27, 0 }
 0x217   : > { %1117 = vst [vmem:[#allocation2 + $0x8] sm:$0xf] %v1115_v24  ;;  %1118 = vst [vmem:[#allocation2 + $0x20] sm:$0xf] %v1116_v54  ;;  %1196 = vmatpush1.msra.mxu0 %v2254_v23  ;;  %v1078_v1 = vpop.permute.xlu1 %1077  ;;  %v1066_v15 = vpop.permute.xlu0 %1065  ;;  %v2294_v20 = vand.u32 4294901760, %v1163_v50 }
 0x218   : > { %v1079_v32 = vsel %vm329_vm5, %v1076_v22, %v1078_v1  ;;  %v1080_v4 = vsel %vm329_vm5, %v1078_v1, %v1076_v22  ;;  %v1281_v3 = vand.u32 4294901760, %v2263_v58  ;;  %v1287_v21 = vand.u32 4294901760, %v2260_v55 }
 0x219   : > { %v1081_v9 = vmul.f32 %v1080_v4, %v2019_v52  ;;  %v1082_v29 = vmul.f32 %v1079_v32, %v2022_v53  ;;  %v2323_v40 = vsub.f32 %v1163_v50, %v2294_v20 }
 0x21a   : > { %v1282_v46 = vsub.f32 %v2263_v58, %v1281_v3  ;;  %v1288_v47 = vsub.f32 %v2260_v55, %v1287_v21 }
 0x21b   : > { %v1085_v51 = vrot.slane %v1081_v9, 4  ;;  %v1086_v56 = vrot.slane %v1082_v29, 4  ;;  %v1052_v57 = vpop.permute.xlu1 %1051  ;;  %v1248_v1 = vand.u32 4294901760, %v2323_v40 }
 0x21c   : > { %v1053_v60 = vsel %vm285_vm6, %v1050_v59, %v1052_v57  ;;  %v1054_v52 = vsel %vm285_vm6, %v1052_v57, %v1050_v59  ;;  %v1283_v53 = vand.u32 4294901760, %v1282_v46  ;;  %v1289_v63 = vand.u32 4294901760, %v1288_v47  ;;  %v1151_v5 = vld [vmem:[#allocation2 + $0x28] sm:$0xff] }
 0x21d   : > { %v1150_v12 = vld [vmem:[#allocation2 + $0x48] sm:$0xff]  ;;  %1089 = vst [vmem:[#allocation2 + $0x18] sm:$0xf0] %v1085_v51  ;;  %1090 = vst [vmem:[#allocation2 + $0x10] sm:$0xf0] %v1086_v56  ;;  %v1055_v16 = vmul.f32 %v1054_v52, %v2033_v61  ;;  %v1056_v17 = vmul.f32 %v1053_v60, %v2036_v62  ;;  %v2290_v18 = vand.u32 4294901760, %v1151_v5  ;;  %v1249_v29 = vsub.f32 %v2323_v40, %v1248_v1 }
 0x21e   : > { %v2292_v19 = vand.u32 4294901760, %v1150_v12  ;;  %1284 = vmatprep.subr.mxu1 %v1283_v53  ;;  %v1153_v30 = vld [vmem:[#allocation2 + $0x20] sm:$0xff]  ;;  %v1152_v31 = vld [vmem:[#allocation2 + $0x8] sm:$0xff] }
 0x21f   : > { %v1059_v35 = vrot.slane %v1055_v16, 4  ;;  %v1060_v36 = vrot.slane %v1056_v17, 4  ;;  %1290 = vmatpush1.msra.mxu1 %v1289_v63  ;;  %v1068_v41 = vpop.permute.xlu1 %1067  ;;  %v2296_v10 = vand.u32 4294901760, %v1153_v30  ;;  %v2298_v42 = vand.u32 4294901760, %v1152_v31 }
 0x220   : > { %v1069_v61 = vsel %vm310_vm8, %v1066_v15, %v1068_v41  ;;  %v1070_v62 = vsel %vm310_vm8, %v1068_v41, %v1066_v15  ;;  %v2305_v43 = vsub.f32 %v1150_v12, %v2292_v19  ;;  %v2308_v25 = vsub.f32 %v1151_v5, %v2290_v18 }
 0x221   : > { %1063 = vst [vmem:[#allocation2 + $0x30] sm:$0xf0] %v1059_v35  ;;  %1064 = vst [vmem:[#allocation2] sm:$0xf0] %v1060_v36  ;;  %v1071_v26 = vmul.f32 %v1070_v62, %v2044_v6  ;;  %v1072_v22 = vmul.f32 %v1069_v61, %v2047_v8  ;;  %1198 = vmatprep.subr.mxu0 %v2296_v10  ;;  %v2314_v28 = vsub.f32 %v1152_v31, %v2298_v42  ;;  %v1040_v6 = vpop.permute.xlu0 %1039 }
 0x222   : > { %v2317_v34 = vsub.f32 %v1153_v30, %v2296_v10  ;;  %1200 = vmatpush1.msra.mxu0 %v2298_v42  ;;  %v1305_v39 = vand.u32 4294901760, %v2308_v25  ;;  %v1311_v13 = vand.u32 4294901760, %v2305_v43  ;;  %v1250_v60 = vand.u32 4294901760, %v1249_v29 }
 0x223   : > { %1073 = vst [vmem:[#allocation2 + $0x18] sm:$0xf] %v1071_v26  ;;  %1074 = vst [vmem:[#allocation2 + $0x10] sm:$0xf] %v1072_v22  ;;  %1202 = vmatprep.subr.mxu0 %v2290_v18  ;;  %v1042_v8 = vpop.permute.xlu1 %1041  ;;  %v1299_v37 = vand.u32 4294901760, %v2314_v28 }
 0x224   : > { %v1293_v14 = vand.u32 4294901760, %v2317_v34  ;;  %v1043_v44 = vsel %vm266_vm9, %v1040_v6, %v1042_v8  ;;  %v1044_v38 = vsel %vm266_vm9, %v1042_v8, %v1040_v6  ;;  %1204 = vmatpush1.msra.mxu0 %v2292_v19  ;;  %v1306_v45 = vsub.f32 %v2308_v25, %v1305_v39 }
 0x225   : > { %v1045_v48 = vmul.f32 %v1044_v38, %v2051_v11  ;;  %v1046_v24 = vmul.f32 %v1043_v44, %v2066_v33  ;;  %v1300_v59 = vsub.f32 %v2314_v28, %v1299_v37  ;;  %v1312_v7 = vsub.f32 %v2305_v43, %v1311_v13 }
 0x226   : > { %v1294_v54 = vsub.f32 %v2317_v34, %v1293_v14  ;;  %v1307_v33 = vand.u32 4294901760, %v1306_v45 }
 0x227   : > { %1047 = vst [vmem:[#allocation2 + $0x30] sm:$0xf] %v1045_v48  ;;  %1048 = vst [vmem:[#allocation2] sm:$0xf] %v1046_v24  ;;  %v1301_v11 = vand.u32 4294901760, %v1300_v59  ;;  %v1313_v32 = vand.u32 4294901760, %v1312_v7 }
 0x228   : > { %v1295_v27 = vand.u32 4294901760, %v1294_v54 }
 0x22a   : > { %1296 = vmatprep.subr.mxu1 %v1295_v27  ;;  %v1149_v4 = vld [vmem:[#allocation2 + $0x10] sm:$0xff]  ;;  %v1148_v9 = vld [vmem:[#allocation2 + $0x18] sm:$0xff] }
 0x22b   : > { %1302 = vmatpush1.msra.mxu1 %v1301_v11  ;;  %v2351_v46 = vand.u32 4294901760, %v1149_v4  ;;  %v2353_v47 = vand.u32 4294901760, %v1148_v9 }
 0x22c   : > { %1308 = vmatprep.subr.mxu1 %v1307_v33 }
 0x22d   : > { %1314 = vmatpush1.msra.mxu1 %v1313_v32  ;;  %1206 = vmatprep.subr.mxu0 %v2351_v46  ;;  %v1322_v50 = vsub.f32 %v1148_v9, %v2353_v47  ;;  %v1316_v51 = vsub.f32 %v1149_v4, %v2351_v46 }
 0x22e   : > { %1208 = vmatpush1.msra.mxu0 %v2353_v47  ;;  %v1147_v56 = vld [vmem:[#allocation2] sm:$0xff]  ;;  %v1146_v57 = vld [vmem:[#allocation2 + $0x30] sm:$0xff] }
 0x22f   : > { %v2359_v52 = vand.u32 4294901760, %v1147_v56  ;;  %v2361_v53 = vand.u32 4294901760, %v1146_v57  ;;  %v1317_v63 = vand.u32 4294901760, %v1316_v51  ;;  %v1323_v5 = vand.u32 4294901760, %v1322_v50 }
 0x231   : > { %1210 = vmatprep.subr.mxu0 %v2359_v52  ;;  %v1334_v12 = vsub.f32 %v1146_v57, %v2361_v53  ;;  %v1318_v15 = vsub.f32 %v1316_v51, %v1317_v63  ;;  %v1324_v16 = vsub.f32 %v1322_v50, %v1323_v5  ;;  %v1328_v17 = vsub.f32 %v1147_v56, %v2359_v52 }
 0x232   : > { %1212 = vmatpush1.msra.mxu0 %v2361_v53 }
 0x233   : > { %1251 = vmatmul.mubr.f32.vlgmr.msra.gmra.mxu0 %v1250_v60  ;;  %1403 = vmatprep.subr.mxu0 %v2263_v58  ;;  %v1319_v30 = vand.u32 4294901760, %v1318_v15  ;;  %v1325_v31 = vand.u32 4294901760, %v1324_v16  ;;  %v1329_v35 = vand.u32 4294901760, %v1328_v17  ;;  %v1335_v36 = vand.u32 4294901760, %v1334_v12 }
 0x234   : > { %1406 = vmatpush1.msra.mxu0 %v2260_v55  ;;  %1463 = vmatprep.mubr.f32.mxu0 %v1852_v2 }
 0x235   : > { %1320 = vmatprep.subr.mxu1 %v1319_v30  ;;  %1409 = vmatprep.subr.mxu0 %v2317_v34  ;;  %v1330_v41 = vsub.f32 %v1328_v17, %v1329_v35  ;;  %v1336_v61 = vsub.f32 %v1334_v12, %v1335_v36 }
 0x236   : > { %1326 = vmatpush1.msra.mxu1 %v1325_v31  ;;  %1412 = vmatpush1.msra.mxu0 %v2314_v28 }
 0x237   : > { %1415 = vmatprep.subr.mxu0 %v2308_v25  ;;  %v1331_v62 = vand.u32 4294901760, %v1330_v41  ;;  %v1337_v26 = vand.u32 4294901760, %v1336_v61 }
 0x238   : > { %1418 = vmatpush1.msra.mxu0 %v2305_v43 }
 0x239   : > { %1332 = vmatprep.subr.mxu1 %v1331_v62  ;;  %1421 = vmatprep.subr.mxu0 %v1316_v51 }
 0x23a   : > { %1338 = vmatpush1.msra.mxu1 %v1337_v26  ;;  %1424 = vmatpush1.msra.mxu0 %v1322_v50 }
 0x23b   : > { %1373 = vmatmul.mubr.f32.vlgmr.msra.gmra.mxu1 %v2294_v20  ;;  %1427 = vmatprep.subr.mxu0 %v1328_v17 }
 0x23c   : > { %1495 = vmatprep.subr.mxu1 %v2252_v49  ;;  %1430 = vmatpush1.msra.mxu0 %v1334_v12 }
 0x23d   : > { %1497 = vmatpush1.msra.mxu1 %v2254_v23  ;;  %1466 = vmatmul.mubr.f32.vlgmr.msra.gmra.mxu0 %v2323_v40 }
 0x23e   : > { %1499 = vmatprep.subr.mxu1 %v2296_v10  ;;  %1581 = vmatprep.subr.mxu0 %v1281_v3 }
 0x23f   : > { %1501 = vmatpush1.msra.mxu1 %v2298_v42  ;;  %1585 = vmatpush1.msra.mxu0 %v1287_v21 }
 0x240   : > { %1503 = vmatprep.subr.mxu1 %v2290_v18  ;;  %1589 = vmatprep.subr.mxu0 %v1293_v14 }
 0x241   : > { %1505 = vmatpush1.msra.mxu1 %v2292_v19  ;;  %1593 = vmatpush1.msra.mxu0 %v1299_v37 }
 0x242   : > { %1507 = vmatprep.subr.mxu1 %v2351_v46  ;;  %1597 = vmatprep.subr.mxu0 %v1305_v39 }
 0x243   : > { %1509 = vmatpush1.msra.mxu1 %v2353_v47  ;;  %1601 = vmatpush1.msra.mxu0 %v1311_v13 }
 0x244   : > { %1511 = vmatprep.subr.mxu1 %v2359_v52  ;;  %1605 = vmatprep.subr.mxu0 %v1317_v63 }
 0x245   : > { %1513 = vmatpush1.msra.mxu1 %v2361_v53  ;;  %1546 = vmatprep.mubr.f32.mxu1 %v1852_v2 }
 0x246   : > { %1609 = vmatpush1.msra.mxu0 %v1323_v5  ;;  %1550 = vmatmul.mubr.f32.vlgmr.msra.gmra.mxu1 %v1248_v1 }
 0x247   : > { %1613 = vmatprep.subr.mxu0 %v1329_v35  ;;  %1681 = vmatprep.subr.mxu1 %v2252_v49 }
 0x248   : > { %1617 = vmatpush1.msra.mxu0 %v1335_v36  ;;  %1650 = vmatprep.mubr.f32.mxu0 %v1852_v2 }
 0x249   : > { %1683 = vmatpush1.msra.mxu1 %v2254_v23  ;;  %1652 = vmatmul.mubr.f32.vlgmr.msra.gmra.mxu0 %v2294_v20 }
 0x24a   : > { %1685 = vmatprep.subr.mxu1 %v2296_v10  ;;  %1732 = vmatprep.mubr.f32.mxu1 %v1852_v2  ;;  %v1160_v2 = vpop.permute.xlu0 %1159 }
 0x24b   : > { %1687 = vmatpush1.msra.mxu1 %v2298_v42 }
 0x24c   : > { %1689 = vmatprep.subr.mxu1 %v2290_v18 }
 0x24d   : > { %1691 = vmatpush1.msra.mxu1 %v2292_v19 }
 0x24e   : > { %1693 = vmatprep.subr.mxu1 %v2351_v46 }
 0x24f   : > { %1695 = vmatpush1.msra.mxu1 %v2353_v47 }
 0x250   : > { %1697 = vmatprep.subr.mxu1 %v2359_v52 }
 0x251   : > { %1699 = vmatpush1.msra.mxu1 %v2361_v53 }
 0x252   : > { %1734 = vmatmul.mubr.f32.vlgmr.msra.gmra.mxu1 %v2294_v20 }
 0x2f3   : > { %v1252_v49 = vpop.f32.mrf.mxu0 }
 0x2f4   : > { %v1253_v21 = vadd.f32 %v1252_v49, %v1160_v2 }
 0x2f5   : > { %v1254_v55 = vpop.f32.mrf.mxu0 }
 0x2f6   : > { %v1255_v18 = vadd.f32 %v1254_v55, %v1160_v2 }
 0x2fb   : > { %v1374_v23 = vpop.f32.mrf.mxu1 }
 0x2fc   : > { %v1375_v19 = vadd.f32 %v1374_v23, %v1253_v21 }
 0x2fd   : > { %v1376_v58 = vpop.f32.mrf.mxu1  ;;  %v1467_v3 = vpop.f32.mrf.mxu0 }
 0x2fe   : > { %v1377_v42 = vadd.f32 %v1376_v58, %v1255_v18  ;;  %v1468_v28 = vadd.f32 %v1467_v3, %v1375_v19 }
 0x2ff   : > { %v1469_v43 = vpop.f32.mrf.mxu0 }
 0x300   : > { %v1470_v34 = vadd.f32 %v1469_v43, %v1377_v42 }
 0x306   : > { %v1551_v10 = vpop.f32.mrf.mxu1 }
 0x307   : > { %v1552_v39 = vadd.f32 %v1551_v10, %v1468_v28 }
 0x308   : > { %v1553_v25 = vpop.f32.mrf.mxu1 }
 0x309   : > { %v1653_v22 = vpop.f32.mrf.mxu0  ;;  %v1554_v13 = vadd.f32 %v1553_v25, %v1470_v34 }
 0x30a   : > { %v1654_v6 = vadd.f32 %v1653_v22, %v1552_v39 }
 0x30b   : > { %v1655_v20 = vpop.f32.mrf.mxu0 }
 0x30c   : > { %v1656_v8 = vadd.f32 %v1655_v20, %v1554_v13 }
 0x312   : > { %v1735_v40 = vpop.f32.mrf.mxu1 }
 0x313   : > { %v1736_v37 = vadd.f32 %v1735_v40, %v1654_v6 }
 0x314   : > { %v1737_v14 = vpop.f32.mrf.mxu1 }
 0x315   : > { %v1738_v44 = vadd.f32 %v1737_v14, %v1656_v8 }
 0x317   : > { %v1742_v38 = vcombine.low %v1736_v37, %v1738_v44 }
 0x319   : > { %v1744_v45 = vadd.f32 %v1742_v38, %v1905_v0 }
 0x31b   : > { %1745 = vst [vmem:[%s251_s8] sm:$0xff] %v1744_v45 }
 0x31c PF: > { %s16_s21 = sadd.s32 1, %s1842_s21  }
 0x31d   : > { %p13_p4 = scmp.ge.s32.totalorder %s16_s21, 4  }
 0x31f   :  { %15 = sbr.rel (!%p13_p4) target bundleno = 1 (0x1), region = 74 }

</bundles_post_ra>
